<compile_context>
chip_gen: v7x
topology: tpu7x:2x2x1
jax: 0.10.0
libtpu: 0.0.40
codegen_flags: <defaults>
</compile_context>

<pallas_src>
import jax
import jax.numpy as jnp
from jax.experimental import pallas as pl
from jax.experimental.pallas import tpu as pltpu

TRIM_H = 28
TRIM_W = 28


def _trim_kernel(x_ref, o_ref):
    # x_ref: (nb, C, H, W) VMEM tile; o_ref: (nb, C, 28, 28) VMEM tile.
    # Static slice of the VMEM view; the surrounding pipeline handles HBM DMA.
    o_ref[...] = x_ref[:, :, :TRIM_H, :TRIM_W]


def _choose_batch_block(N, plane_bytes, vmem_block_budget):
    """Largest batch-block nb (divisor of N) whose input block fits the VMEM
    budget, preferring to leave >= 2 grid steps (v7x megacore gets both TCs)."""
    divisors = [d for d in range(1, N + 1) if N % d == 0]
    fitting = [d for d in divisors if d * plane_bytes <= vmem_block_budget] or [1]
    multi_step = [d for d in fitting if N // d >= 2]
    return max(multi_step) if multi_step else max(fitting)


def trim(x, *, vmem_block_budget=2 << 20):
    """x: (N, C, H, W) with H >= 28, W >= 28. Returns x[:, :, :28, :28]."""
    N, C, H, W = x.shape
    assert H >= TRIM_H and W >= TRIM_W, "Trim expects spatial dims >= 28"

    itemsize = jnp.dtype(x.dtype).itemsize
    plane_bytes = C * H * W * itemsize
    nb = _choose_batch_block(N, plane_bytes, vmem_block_budget)

    return pl.pallas_call(
        _trim_kernel,
        out_shape=jax.ShapeDtypeStruct((N, C, TRIM_H, TRIM_W), x.dtype),
        grid_spec=pl.GridSpec(
            grid=(N // nb,),
            in_specs=[
                # Coarse (nb, C, H, W) slab; last two block dims equal the full
                # array dims, so the (8, 128) divisibility rule is satisfied.
                pl.BlockSpec((nb, C, H, W), lambda i: (i, 0, 0, 0)),
            ],
            out_specs=pl.BlockSpec(
                (nb, C, TRIM_H, TRIM_W), lambda i: (i, 0, 0, 0)
            ),
        ),
        compiler_params=pltpu.CompilerParams(
            dimension_semantics=("parallel",),
        ),
    )(x)


if __name__ == "__main__":
    key = jax.random.PRNGKey(0)

    # VAE-decoder-style NCHW input with spatial dims > 28 so the trim is
    # non-trivial: all channels + batch coarsened into each grid step.
    x1 = jax.random.normal(key, (2, 4, 32, 32), dtype=jnp.float32)
    y1 = trim(x1)
    jax.block_until_ready(y1)
    assert y1.shape == (2, 4, 28, 28), y1.shape
    assert jnp.array_equal(y1, x1[:, :, :28, :28]), "Pallas trim mismatch (case 1)"

    # MNIST-VAE-like shape (C=1, odd spatial) to exercise batch-block coarsening.
    x2 = jax.random.normal(jax.random.PRNGKey(0), (8, 1, 29, 29), dtype=jnp.float32)
    y2 = trim(x2)
    jax.block_until_ready(y2)
    assert y2.shape == (8, 1, 28, 28), y2.shape
    assert jnp.array_equal(y2, x2[:, :, :28, :28]), "Pallas trim mismatch (case 2)"

    print("KERNEL_OK")
</pallas_src>

<mosaic_0001>
module attributes {stable_mosaic.version = 11 : i64} {
  func.func @_trim_kernel(%arg0: i32, %arg1: memref<1x4x32x32xf32, #tpu.memory_space<vmem>>, %arg2: memref<1x4x28x28xf32, #tpu.memory_space<vmem>>) attributes {dimension_semantics = [#tpu.dimension_semantics<parallel>], iteration_bounds = array<i64: 2>, scalar_prefetch = 0 : i64, scratch_operands = 0 : i64, tpu.core_type = #tpu.core_type<tc>, window_params = [{transform_indices = @transform_0, window_bounds = array<i64: 1, 4, 32, 32>}, {transform_indices = @transform_1, window_bounds = array<i64: 1, 4, 28, 28>}]} {
    %c0 = arith.constant 0 : index
    %c0_0 = arith.constant 0 : index
    %c0_1 = arith.constant 0 : index
    %c0_2 = arith.constant 0 : index
    %0 = vector.load %arg1[%c0, %c0_0, %c0_1, %c0_2] : memref<1x4x32x32xf32, #tpu.memory_space<vmem>>, vector<1x4x28x28xf32>
    %c0_3 = arith.constant 0 : index
    %c0_4 = arith.constant 0 : index
    %c0_5 = arith.constant 0 : index
    %c0_6 = arith.constant 0 : index
    %1 = vector.load %arg2[%c0_3, %c0_4, %c0_5, %c0_6] : memref<1x4x28x28xf32, #tpu.memory_space<vmem>>, vector<1x4x28x28xf32>
    tpu.vector_store %arg2[%c0_3, %c0_4, %c0_5, %c0_6], %0 {strides = array<i32>} : memref<1x4x28x28xf32, #tpu.memory_space<vmem>>, vector<1x4x28x28xf32>,
    return
  }
  func.func @transform_0(%arg0: i32) -> (i32, i32, i32, i32) {
    %c0_i32 = arith.constant 0 : i32
    %c0_i32_0 = arith.constant 0 : i32
    %c0_i32_1 = arith.constant 0 : i32
    %c0_i32_2 = arith.constant 0 : i32
    return %arg0, %c0_i32, %c0_i32_0, %c0_i32_1 : i32, i32, i32, i32
  }
  func.func @transform_1(%arg0: i32) -> (i32, i32, i32, i32) {
    %c0_i32 = arith.constant 0 : i32
    %c0_i32_0 = arith.constant 0 : i32
    %c0_i32_1 = arith.constant 0 : i32
    %c0_i32_2 = arith.constant 0 : i32
    return %arg0, %c0_i32, %c0_i32_0, %c0_i32_1 : i32, i32, i32, i32
  }
}

</mosaic_0001>

<bundles_post_ra>
// kernel: tpu_custom_call.1
= control target key start
LH: loop header
LB: loop body
LE: loop exit
PB: predicated region body
PF: predicated region fallthrough
CT: control target
= control target key end

     0   :  { %6 = vsyncpa [#allocation3], 0  ;;  %s532_s0 = inlined_call_operand.hbm [shape: f32[2,4,32,32], index: 0, kind: input, shape index: {}]   ;;  %s533_s1 = inlined_call_operand.vmem [shape: f32[2,4,28,28], index: 1, kind: output, shape index: {}]  }
   0x1   :  { %8 = vsyncpa [#allocation3 + $0x1], 0  ;;  %s372_s6 = smov 0   ;;  %s374_s7 = smov 0  }
   0x2   :  { %s376_s8 = smov 0   ;;  %s378_s9 = smov 0  }
   0x3 LB: > { %s391_s10 = sadd.s32 4294967295, %s357_s9   ;;  %s394_s11 = sadd.s32 1, %s357_s9   ;;  %s357_s9 = sphi %s378_s9, %s540_s9   ;;  %s353_s8 = sphi %s376_s8, %s539_s8   ;;  %s349_s7 = sphi %s374_s7, %s538_s7   ;;  %s345_s6 = sphi %s372_s6, %s537_s6  }
   0x4   : > { %s18_s12 = ssub.s32 %s357_s9, %s394_s11  ;;  %s21_s13 = sadd.s32 1, %s353_s8 }
   0x5   : > { %p19_p0 = scmp.eq.s32.totalorder %s18_s12, 0  ;;  %p28_p1 = scmp.ne.s32.totalorder %s353_s8, %s349_s7 }
   0x6   : > { %p29_p2 = scmp.eq.s32.totalorder %s357_s9, 0  ;;  %p34_p3 = scmp.ne.s32.totalorder %s349_s7, %s345_s6 }
   0x7   : > { %s404_s14 = scalar_select %p19_p0, %s353_s8, %s21_s13  }
   0x8   : > { %p30_p4 = por %p29_p2, %p28_p1  ;;  %p35_p5 = scmp.eq.s32.totalorder %s391_s10, 0 }
   0x9   : > { %p258_p6 = scmp.lt.s32.totalorder %s357_s9, 2  ;;  %s84_s16 = sand.u32 1, %s353_s8  }
   0xa   : > { %p408_p7 = por %p35_p5, %p34_p3  ;;  %s241_s17 = sshll.u32 %s84_s16, 7 }
   0xb   : > { %s250_s18 = sshll.u32 %s357_s9, 11  ;;  %s88_s22 = scalar_lea.vmem [#allocation2], %s241_s17 }
   0xc   : > { %s417_s21 = scalar_lea.hbm %s532_s0, %s250_s18  ;;  %s95_s23 = sshll.u32 %s88_s22, 4  ;;  %s419_s23 = int_to_ptr.vmem [resolvable:$true] %s95_s23 }
   0xd   : > { %p421_p8 = pnand %p258_p6, %p30_p4  ;;  %s426_s25 = scalar_lea.sflag [#allocation3], %s84_s16 }
   0xe   : > { %s293_s26 = scalar_lea.hbm %s417_s21, 2048  ;;  %s298_s29 = scalar_lea.hbm %s532_s0, 4096 }
   0xf   : > { %p294_p10 = scmp.ne.s32.totalorder %s417_s21, %s293_s26  ;;  %p295_p11 = pneg %p421_p8 }
  0x10   : > { %p299_p0 = scmp.lt.u32.totalorder %s417_s21, %s532_s0  ;;  %p300_p1 = scmp.lt.u32.totalorder %s298_s29, %s293_s26 }
  0x11   : > { %p296_p12 = pnand %p295_p11, %p294_p10  ;;  %p302_p3 = scmp.lt.u32.totalorder %s293_s26, %s417_s21 }
  0x12   : > { %p301_p2 = por %p300_p1, %p299_p0 }
  0x13   : > { %p297_p13 = pneg %p296_p12 }
  0x14   : > { %p303_p4 = por %p302_p3, %p301_p2 }
  0x16   : > { %p304_p5 = pnand %p303_p4, %p297_p13 }
  0x18   : > { %307 = shalt.err (!%p304_p5)
}
  0x19   : > { %s308_s3 = scalar_lea.vmem %s419_s23, 2048  ;;  %s359_s4 = smov [#allocation2]  }
  0x1a   : > { %p309_p6 = scmp.ne.s32.totalorder %s419_s23, %s308_s3  ;;  %s313_s5 = sshll.u32 %s359_s4, 4  ;;  %s314_s5 = int_to_ptr.vmem [resolvable:$false] %s313_s5 }
  0x1b   : > { %s315_s6 = scalar_lea.vmem %s314_s5, 4096  ;;  %p316_p9 = scmp.lt.s32.totalorder %s419_s23, %s314_s5 }
  0x1c   : > { %p311_p10 = pnand %p309_p6, %p295_p11  ;;  %p317_p0 = scmp.lt.s32.totalorder %s315_s6, %s308_s3 }
  0x1e   : > { %p312_p12 = pneg %p311_p10  ;;  %p318_p1 = por %p317_p0, %p316_p9 }
  0x20   : > { %p319_p2 = pnand %p318_p1, %p312_p12 }
  0x22   : > { %322 = shalt.err (!%p319_p2)
}
  0x23   : > { %s360_s12 = smov 128   ;;  %s361_s13 = smov 8  }
  0x24   : > { %257 = dma.hbm_to_vmem [thread:$0]  (!%p421_p8), %s417_s21, 2048, %s419_s23, %s426_s25, %s360_s12, %s360_s12, %s361_s13  }
  0x25   : > { %p103_p11 = scmp.lt.s32.totalorder %s357_s9, 3  ;;  %p536_p13 = scmp.ge.s32.totalorder %s357_s9, 1 }
  0x27   : > { %p104_p3 = pnand %p536_p13, %p103_p11 }
  0x28   : > { %s109_s16 = sand.u32 (!%p104_p3), 1, %s349_s7  }
  0x29   : > { %107 = sbr.rel (%p104_p3) target bundleno = 62 (0x3e), region = 24  ;;  %s245_s17 = sshll.u32 (!%p104_p3), %s109_s16, 7 }
  0x2a   : > { %s110_s18 = scalar_lea.sflag (!%p104_p3), [#allocation3], %s109_s16  ;;  %s458_s19 = scalar_lea.vmem (!%p104_p3), [#allocation2], %s245_s17 }
  0x30   : > { %340 = dma.done.wait (%p408_p7), %s110_s18, 2048  }
  0x31   : > { %342 = vsyncadd (%p408_p7), %s110_s18, 4294965248  ;;  %p132_p8 = scmp.lt.s32.totalorder %s391_s10, 1  ;;  %vm153_vm0 = vcmask 228352   ;;  %vm157_vm1 = vcmask 224256   ;;  %v137_v0 = vld [vmem:[%s458_s19] sm:$0xff]  ;;  %v138_v1 = vld [vmem:[%s458_s19 + $0x8] sm:$0xff] }
  0x32   : > { %v139_v2 = vld [vmem:[%s458_s19 + $0x10] sm:$0xff]  ;;  %v140_v3 = vld [vmem:[%s458_s19 + $0x18] sm:$0xf]  ;;  %v141_v4 = vld [vmem:[%s458_s19 + $0x20] sm:$0xff] }
  0x33   : > { %s542_s10 = smov (!%p132_p8, %s391_s10), 1  ;;  %v142_v5 = vld [vmem:[%s458_s19 + $0x28] sm:$0xff]  ;;  %v143_v6 = vld [vmem:[%s458_s19 + $0x30] sm:$0xff]  ;;  %v144_v7 = vld [vmem:[%s458_s19 + $0x38] sm:$0xf] }
  0x34   : > { %s251_s9 = sshll.u32 %s542_s10, 7  ;;  %v145_v8 = vld [vmem:[%s458_s19 + $0x40] sm:$0xff]  ;;  %v146_v9 = vld [vmem:[%s458_s19 + $0x48] sm:$0xff]  ;;  %v147_v10 = vld [vmem:[%s458_s19 + $0x50] sm:$0xff] }
  0x35   : > { %s469_s22 = scalar_lea.vmem %s533_s1, %s251_s9  ;;  %v148_v11 = vld [vmem:[%s458_s19 + $0x58] sm:$0xf]  ;;  %v149_v12 = vld [vmem:[%s458_s19 + $0x60] sm:$0xff]  ;;  %v150_v13 = vld [vmem:[%s458_s19 + $0x68] sm:$0xff] }
  0x36   : > { %154 = vst.msk [vmem:[%s469_s22] sm:$0xff] %vm153_vm0, %v137_v0  ;;  %155 = vst.msk [vmem:[%s469_s22 + $0x8] sm:$0xff] %vm153_vm0, %v138_v1  ;;  %v151_v14 = vld [vmem:[%s458_s19 + $0x70] sm:$0xff]  ;;  %v152_v15 = vld [vmem:[%s458_s19 + $0x78] sm:$0xf] }
  0x37   : > { %156 = vst.msk [vmem:[%s469_s22 + $0x10] sm:$0xff] %vm153_vm0, %v139_v2  ;;  %159 = vst.msk [vmem:[%s469_s22 + $0x20] sm:$0xff] %vm153_vm0, %v141_v4 }
  0x38   : > { %158 = vst.msk [vmem:[%s469_s22 + $0x18] sm:$0xf] %vm157_vm1, %v140_v3  ;;  %162 = vst.msk [vmem:[%s469_s22 + $0x38] sm:$0xf] %vm157_vm1, %v144_v7 }
  0x39   : > { %160 = vst.msk [vmem:[%s469_s22 + $0x28] sm:$0xff] %vm153_vm0, %v142_v5  ;;  %161 = vst.msk [vmem:[%s469_s22 + $0x30] sm:$0xff] %vm153_vm0, %v143_v6 }
  0x3a   : > { %163 = vst.msk [vmem:[%s469_s22 + $0x40] sm:$0xff] %vm153_vm0, %v145_v8  ;;  %164 = vst.msk [vmem:[%s469_s22 + $0x48] sm:$0xff] %vm153_vm0, %v146_v9 }
  0x3b   : > { %165 = vst.msk [vmem:[%s469_s22 + $0x50] sm:$0xff] %vm153_vm0, %v147_v10  ;;  %167 = vst.msk [vmem:[%s469_s22 + $0x60] sm:$0xff] %vm153_vm0, %v149_v12 }
  0x3c   : > { %166 = vst.msk [vmem:[%s469_s22 + $0x58] sm:$0xf] %vm157_vm1, %v148_v11  ;;  %170 = vst.msk [vmem:[%s469_s22 + $0x78] sm:$0xf] %vm157_vm1, %v152_v15 }
  0x3d   : > { %168 = vst.msk [vmem:[%s469_s22 + $0x68] sm:$0xff] %vm153_vm0, %v150_v13  ;;  %169 = vst.msk [vmem:[%s469_s22 + $0x70] sm:$0xff] %vm153_vm0, %v151_v14 }
  0x3e PF: > { %p11_p7 = scmp.ge.s32.totalorder %s394_s11, 4   ;;  %s537_s6 = smov %s349_s7 }
  0x3f   : > { %s538_s7 = smov %s353_s8  ;;  %s539_s8 = smov %s404_s14 }
  0x40   : > { %s540_s9 = smov %s394_s11  ;;  %13 = sbr.rel (!%p11_p7) target bundleno = 3 (0x3), region = 64 }
  0x47   :  { %192 = vsyncpa [#allocation3], 1 }
  0x48   :  { %194 = vsyncpa [#allocation3 + $0x1], 1 }

</bundles_post_ra>
